<compile_context>
chip_gen: v7x
topology: tpu7x:2x2x1
jax: 0.10.0
libtpu: 0.0.40
codegen_flags: <defaults>
</compile_context>

<pallas_src>
import functools

import jax
import jax.numpy as jnp
from jax.experimental import pallas as pl
from jax.experimental.pallas import tpu as pltpu


def _mha_kernel(x_ref, wqkv_ref, bqkv_ref, out_ref, amap_ref, o_acc_ref, *,
                num_heads, head_dim, bt, n):
    d = num_heads * head_dim

    # Fused Q/K/V projection: one (bt*n, d) x (d, 3d) MXU matmul with bf16
    # operands and f32 accumulation, plus f32 bias.
    qkv = jnp.dot(x_ref[...], wqkv_ref[...],
                  preferred_element_type=jnp.float32) + bqkv_ref[...]

    # Fold the 1/sqrt(head_dim) rescaler into q once (f32, cheap VPU op).
    inv_scale = jnp.float32(1.0 / (head_dim ** 0.5))
    q = qkv[:, :d] * inv_scale
    k = qkv[:, d:2 * d]
    v = qkv[:, 2 * d:3 * d]

    # Static loop over heads.  A fully batched (bt, H, n, hd) formulation needs
    # either a 4-D transpose or a two-batch-dim dot_general, neither of which
    # lowers reliably in Mosaic; instead each head slices the lane-dense qkv
    # block once and writes its results out immediately, so no per-head value
    # stays live past its iteration (bounded vreg/VMEM pressure).
    for h in range(num_heads):
        sl = slice(h * head_dim, (h + 1) * head_dim)
        qh = q[:, sl].reshape(bt, n, head_dim).astype(jnp.bfloat16)
        kh = k[:, sl].reshape(bt, n, head_dim).astype(jnp.bfloat16)
        vh = v[:, sl].reshape(bt, n, head_dim).astype(jnp.bfloat16)

        # Scores via a batched contraction on the trailing dims (MXU, f32 acc).
        s = jnp.einsum('bnd,bmd->bnm', qh, kh,
                       preferred_element_type=jnp.float32)          # (bt, n, n)

        # Numerically-stable softmax along the last axis, all in f32.
        # Normalization is exact so stored attention rows sum to 1 (torch parity).
        s = s - jnp.max(s, axis=-1, keepdims=True)
        e = jnp.exp(s)
        attn = e / jnp.sum(e, axis=-1, keepdims=True)

        # Contiguous (bt, 1, n, n) slab write into the output block; the block
        # is DMA'd to HBM once per grid step regardless of per-head writes.
        amap_ref[:, h, :, :] = attn.astype(amap_ref.dtype)

        # attn @ V on the MXU with bf16 operands, f32 accumulation, written
        # straight into the VMEM scratch accumulator.
        oh = jnp.einsum('bnm,bmd->bnd', attn.astype(jnp.bfloat16), vh,
                        preferred_element_type=jnp.float32)          # (bt, n, hd)
        o_acc_ref[:, sl] = oh.reshape(bt * n, head_dim)

    # Single full-width (D-lane) store of the gathered heads per grid step.
    out_ref[...] = o_acc_ref[...]


def _cores_per_chip():
    # v7x has 2 TensorCores per chip (grid axis is sharded across them when
    # marked "parallel"); earlier generations have 1.
    try:
        kind = jax.devices()[0].device_kind.lower()
    except Exception:
        return 1
    return 2 if "v7" in kind else 1


def _vmem_capacity_bytes():
    try:
        return int(pltpu.get_tpu_info().vmem_capacity_bytes)
    except Exception:
        return 64 << 20  # conservative default (v7x per-core VMEM)


def _estimate_vmem_bytes(bt, n, d, h, amap_itemsize):
    """Worst-case resident VMEM for one grid step: double-buffered pipeline
    blocks plus in-kernel intermediates and the output scratch."""
    rows = bt * n
    pipelined = (
        2 * rows * d * 2                        # x block (bf16), double-buffered
        + 2 * rows * d * 4                      # attention output block (f32)
        + 2 * bt * h * n * n * amap_itemsize    # attention_map block
        + 2 * d * 3 * d * 2                     # fused Wqkv (bf16)
        + 2 * 3 * d * 4                         # fused bias (f32)
    )
    intermediates = (
        rows * 3 * d * 4                        # qkv intermediate (f32)
        + rows * 3 * d * 2                      # bf16 per-head operand copies
        + 2 * bt * n * n * 4                    # scores + exp for one head (f32)
        + rows * d * 4                          # o_acc scratch
    )
    return pipelined + intermediates


def _pick_batch_tile(B, n, d, h, amap_itemsize, *, target_rows=512):
    """Largest divisor of B that (a) keeps the grid >= num TensorCores,
    (b) respects the sublane-divisibility rule on tiled blocks, (c) fits the
    VMEM budget; stop early once the tile reaches `target_rows` rows."""
    vmem_cap = _vmem_capacity_bytes()
    budget = int(0.45 * vmem_cap)              # headroom for compiler temps/spills
    cores = _cores_per_chip()
    max_bt = B // cores if (cores > 1 and B >= cores) else B

    best = None
    for bt in range(1, max_bt + 1):
        if B % bt:
            continue
        # Tiled (grid > 1) blocks: bt*n rows must satisfy the sublane rule.
        # Use 16 (bf16 x block packs rows in pairs); full-array blocks are exempt.
        if bt < B and (bt * n) % 16:
            continue
        if _estimate_vmem_bytes(bt, n, d, h, amap_itemsize) > budget:
            break
        best = bt
        if bt * n >= target_rows:
            break
    if best is None:
        # No legal tiling (e.g. n not divisible by 8/16 with small B):
        # fall back to one untiled grid step, which is always legal.
        best = B
    return best, vmem_cap


def multi_head_attention(x, wq, bq, wk, bk, wv, bv, *, num_heads,
                         batch_tile=None, amap_dtype=jnp.float32):
    """x: (B, N, D).  w*: (D, D) stored (in, out).  b*: (D,).

    Returns (attention (B,N,D) float32, attention_map (B,H,N,N) amap_dtype).
    Set amap_dtype=jnp.bfloat16 to halve the dominant HBM write when exact f32
    parity of the returned attention map is not required.
    """
    B, N, D = x.shape
    assert D % num_heads == 0
    head_dim = D // num_heads

    # bf16 MXU operands (module semantics are f32; accumulation and softmax
    # stay f32 inside the kernel).  Casting here halves input/weight DMA bytes.
    x2 = x.reshape(B * N, D).astype(jnp.bfloat16)
    wqkv = jnp.concatenate([wq, wk, wv], axis=1).astype(jnp.bfloat16)      # (D, 3D)
    bqkv = jnp.concatenate([bq, bk, bv]).reshape(1, 3 * D).astype(jnp.float32)

    amap_itemsize = jnp.dtype(amap_dtype).itemsize
    if batch_tile is None:
        bt, vmem_cap = _pick_batch_tile(B, N, D, num_heads, amap_itemsize)
    else:
        bt, vmem_cap = batch_tile, _vmem_capacity_bytes()
    grid = (B // bt,)

    est = _estimate_vmem_bytes(bt, N, D, num_heads, amap_itemsize)
    vmem_limit = int(min(vmem_cap, max(2 * est + (8 << 20), 16 << 20)))

    kernel = functools.partial(_mha_kernel, num_heads=num_heads,
                               head_dim=head_dim, bt=bt, n=N)

    flops = 2 * B * N * D * (3 * D) + 4 * B * N * N * D
    bytes_accessed = (2 * B * N * D + 2 * D * 3 * D + 4 * 3 * D
                      + 4 * B * N * D + amap_itemsize * B * num_heads * N * N)
    cost = pl.CostEstimate(flops=flops,
                           transcendentals=B * num_heads * N * N,
                           bytes_accessed=bytes_accessed)

    out2, attention_map = pl.pallas_call(
        kernel,
        out_shape=(
            jax.ShapeDtypeStruct((B * N, D), jnp.float32),               # attention (flat)
            jax.ShapeDtypeStruct((B, num_heads, N, N), amap_dtype),      # attention_map
        ),
        grid_spec=pltpu.PrefetchScalarGridSpec(
            num_scalar_prefetch=0,
            grid=grid,
            in_specs=[
                pl.BlockSpec((bt * N, D), lambda b: (b, 0)),             # x rows (bf16)
                pl.BlockSpec((D, 3 * D), lambda b: (0, 0)),              # fused Wqkv (bf16)
                pl.BlockSpec((1, 3 * D), lambda b: (0, 0)),              # fused bias (f32)
            ],
            out_specs=[
                pl.BlockSpec((bt * N, D), lambda b: (b, 0)),
                pl.BlockSpec((bt, num_heads, N, N), lambda b: (b, 0, 0, 0)),
            ],
            scratch_shapes=[pltpu.VMEM((bt * N, D), jnp.float32)],       # per-step output acc
        ),
        compiler_params=pltpu.CompilerParams(
            dimension_semantics=("parallel",),
            vmem_limit_bytes=vmem_limit),
        cost_estimate=cost,
    )(x2, wqkv, bqkv)

    return out2.reshape(B, N, D), attention_map


def _reference(x, wq, bq, wk, bk, wv, bv, num_heads):
    """Pure-JAX f32 reference mirroring the PyTorch forward exactly."""
    B, N, D = x.shape
    hd = D // num_heads
    q = x @ wq + bq
    k = x @ wk + bk
    v = x @ wv + bv
    q = q.reshape(B, N, num_heads, hd).transpose(0, 2, 1, 3)          # (B,H,N,hd)
    kT = k.reshape(B, N, num_heads, hd).transpose(0, 2, 3, 1)         # (B,H,hd,N)
    v = v.reshape(B, N, num_heads, hd).transpose(0, 2, 1, 3)          # (B,H,N,hd)
    amap = jax.nn.softmax(q @ kT / jnp.sqrt(jnp.float32(hd)), axis=-1)
    out = (amap @ v).transpose(0, 2, 1, 3).reshape(B, N, D)
    return out, amap


if __name__ == "__main__":
    # Small shapes consistent with the module: latent_vec_dim=32, num_heads=4
    B, N, D = 2, 8, 32
    NUM_HEADS = 4
    DROPOUT = 0.0  # inference-mode dropout -> identity

    key = jax.random.PRNGKey(0)
    kx, kq, kbq, kk, kbk, kv, kbv = jax.random.split(key, 7)

    x = jax.random.normal(kx, (B, N, D), dtype=jnp.float32)
    # nn.Linear-style deterministic init (uniform in +-1/sqrt(D)), weights stored (in, out)
    bound = 1.0 / (D ** 0.5)
    wq = jax.random.uniform(kq, (D, D), jnp.float32, -bound, bound)
    bq = jax.random.uniform(kbq, (D,), jnp.float32, -bound, bound)
    wk = jax.random.uniform(kk, (D, D), jnp.float32, -bound, bound)
    bk = jax.random.uniform(kbk, (D,), jnp.float32, -bound, bound)
    wv = jax.random.uniform(kv, (D, D), jnp.float32, -bound, bound)
    bv = jax.random.uniform(kbv, (D,), jnp.float32, -bound, bound)

    attn, amap = multi_head_attention(x, wq, bq, wk, bk, wv, bv, num_heads=NUM_HEADS)
    jax.block_until_ready((attn, amap))

    ref_attn, ref_amap = _reference(x, wq, bq, wk, bk, wv, bv, NUM_HEADS)
    assert attn.shape == (B, N, D) and amap.shape == (B, NUM_HEADS, N, N)
    # Softmax normalization is exact (no approx reciprocal): rows sum to 1.
    assert jnp.allclose(jnp.sum(amap, axis=-1), 1.0, atol=1e-5)
    # Tolerance reflects bf16 MXU operands (requested optimization) vs. the
    # pure-f32 reference, not any approximation inside the softmax.
    assert jnp.allclose(attn, ref_attn, atol=2e-2, rtol=2e-2)
    assert jnp.allclose(amap, ref_amap, atol=2e-2, rtol=2e-2)

    print("KERNEL_OK")
</pallas_src>

<mosaic_0001>
module attributes {stable_mosaic.version = 11 : i64} {
  func.func @_mha_kernel(%arg0: i32, %arg1: memref<16x32xbf16, #tpu.memory_space<vmem>>, %arg2: memref<32x96xbf16, #tpu.memory_space<vmem>>, %arg3: memref<1x96xf32, #tpu.memory_space<vmem>>, %arg4: memref<16x32xf32, #tpu.memory_space<vmem>>, %arg5: memref<2x4x8x8xf32, #tpu.memory_space<vmem>>, %arg6: memref<16x32xf32, #tpu.memory_space<vmem>>) attributes {dimension_semantics = [#tpu.dimension_semantics<parallel>], iteration_bounds = array<i64: 1>, scalar_prefetch = 0 : i64, scratch_operands = 1 : i64, tpu.core_type = #tpu.core_type<tc>, window_params = [{transform_indices = @transform_0, window_bounds = array<i64: 16, 32>}, {pipeline_mode = #tpu.pipeline_mode<synchronous>, transform_indices = @transform_1, window_bounds = array<i64: 32, 96>}, {pipeline_mode = #tpu.pipeline_mode<synchronous>, transform_indices = @transform_2, window_bounds = array<i64: 1, 96>}, {transform_indices = @transform_3, window_bounds = array<i64: 16, 32>}, {transform_indices = @transform_4, window_bounds = array<i64: 2, 4, 8, 8>}]} {
    %c0 = arith.constant 0 : index
    %c0_0 = arith.constant 0 : index
    %0 = vector.load %arg1[%c0, %c0_0] : memref<16x32xbf16, #tpu.memory_space<vmem>>, vector<16x32xbf16>
    %c0_1 = arith.constant 0 : index
    %c0_2 = arith.constant 0 : index
    %1 = vector.load %arg2[%c0_1, %c0_2] : memref<32x96xbf16, #tpu.memory_space<vmem>>, vector<32x96xbf16>
    %cst = arith.constant dense<0.000000e+00> : vector<16x96xf32>
    %2 = tpu.matmul %0, %1, %cst {dimension_numbers = #tpu.dot_dimension_numbers<[1], [0], [0], [1], [0, 0, 1, 1], [], []>} : vector<16x32xbf16>, vector<32x96xbf16>, vector<16x96xf32> -> vector<16x96xf32>
    %c0_3 = arith.constant 0 : index
    %c0_4 = arith.constant 0 : index
    %3 = vector.load %arg3[%c0_3, %c0_4] : memref<1x96xf32, #tpu.memory_space<vmem>>, vector<1x96xf32>
    %4 = vector.broadcast %3 : vector<1x96xf32> to vector<16x96xf32>
    %5 = arith.addf %2, %4 : vector<16x96xf32>
    %6 = vector.extract_strided_slice %5 {offsets = [0, 0], sizes = [16, 32], strides = [1, 1]} : vector<16x96xf32> to vector<16x32xf32>
    %cst_5 = arith.constant 0.353553385 : f32
    %7 = vector.broadcast %cst_5 : f32 to vector<16x32xf32>
    %8 = arith.mulf %6, %7 : vector<16x32xf32>
    %9 = vector.extract_strided_slice %5 {offsets = [0, 32], sizes = [16, 32], strides = [1, 1]} : vector<16x96xf32> to vector<16x32xf32>
    %10 = vector.extract_strided_slice %5 {offsets = [0, 64], sizes = [16, 32], strides = [1, 1]} : vector<16x96xf32> to vector<16x32xf32>
    %11 = vector.extract_strided_slice %8 {offsets = [0, 0], sizes = [16, 8], strides = [1, 1]} : vector<16x32xf32> to vector<16x8xf32>
    %12 = vector.shape_cast %11 : vector<16x8xf32> to vector<2x8x8xf32>
    %13 = arith.truncf %12 : vector<2x8x8xf32> to vector<2x8x8xbf16>
    %14 = vector.extract_strided_slice %9 {offsets = [0, 0], sizes = [16, 8], strides = [1, 1]} : vector<16x32xf32> to vector<16x8xf32>
    %15 = vector.shape_cast %14 : vector<16x8xf32> to vector<2x8x8xf32>
    %16 = arith.truncf %15 : vector<2x8x8xf32> to vector<2x8x8xbf16>
    %17 = vector.extract_strided_slice %10 {offsets = [0, 0], sizes = [16, 8], strides = [1, 1]} : vector<16x32xf32> to vector<16x8xf32>
    %18 = vector.shape_cast %17 : vector<16x8xf32> to vector<2x8x8xf32>
    %19 = arith.truncf %18 : vector<2x8x8xf32> to vector<2x8x8xbf16>
    "tpu.trace_start"() <{level = 10 : i32, message = "bnd,bmd->bnm"}> : () -> ()
    %cst_6 = arith.constant dense<0.000000e+00> : vector<2x8x8xf32>
    %20 = tpu.matmul %13, %16, %cst_6 {dimension_numbers = #tpu.dot_dimension_numbers<[2], [2], [1], [1], [0, 0, 0, 1, 1, 1], [0], [0]>} : vector<2x8x8xbf16>, vector<2x8x8xbf16>, vector<2x8x8xf32> -> vector<2x8x8xf32>
    "tpu.trace_stop"() : () -> ()
    %cst_7 = arith.constant dense<0xFF800000> : vector<2x8xf32>
    %21 = vector.multi_reduction <maximumf>, %20, %cst_7 [2] : vector<2x8x8xf32> to vector<2x8xf32>
    %22 = vector.shape_cast %21 : vector<2x8xf32> to vector<2x8x1xf32>
    %23 = vector.broadcast %22 : vector<2x8x1xf32> to vector<2x8x8xf32>
    %24 = arith.subf %20, %23 : vector<2x8x8xf32>
    %25 = math.exp %24 : vector<2x8x8xf32>
    %cst_8 = arith.constant dense<0.000000e+00> : vector<2x8xf32>
    %26 = vector.multi_reduction <add>, %25, %cst_8 [2] : vector<2x8x8xf32> to vector<2x8xf32>
    %27 = vector.shape_cast %26 : vector<2x8xf32> to vector<2x8x1xf32>
    %28 = vector.broadcast %27 : vector<2x8x1xf32> to vector<2x8x8xf32>
    %29 = arith.divf %25, %28 : vector<2x8x8xf32>
    %c0_9 = arith.constant 0 : index
    %c0_10 = arith.constant 0 : index
    %c0_11 = arith.constant 0 : index
    %c0_12 = arith.constant 0 : index
    %30 = vector.load %arg5[%c0_9, %c0_10, %c0_11, %c0_12] : memref<2x4x8x8xf32, #tpu.memory_space<vmem>>, vector<2x1x8x8xf32>
    %31 = vector.shape_cast %30 : vector<2x1x8x8xf32> to vector<2x8x8xf32>
    %32 = vector.shape_cast %29 : vector<2x8x8xf32> to vector<2x1x8x8xf32>
    tpu.vector_store %arg5[%c0_9, %c0_10, %c0_11, %c0_12], %32 {strides = array<i32>} : memref<2x4x8x8xf32, #tpu.memory_space<vmem>>, vector<2x1x8x8xf32>,
    %33 = arith.truncf %29 : vector<2x8x8xf32> to vector<2x8x8xbf16>
    "tpu.trace_start"() <{level = 10 : i32, message = "bnm,bmd->bnd"}> : () -> ()
    %cst_13 = arith.constant dense<0.000000e+00> : vector<2x8x8xf32>
    %34 = tpu.matmul %33, %19, %cst_13 {dimension_numbers = #tpu.dot_dimension_numbers<[2], [1], [1], [2], [0, 0, 0, 1, 1, 2], [0], [0]>} : vector<2x8x8xbf16>, vector<2x8x8xbf16>, vector<2x8x8xf32> -> vector<2x8x8xf32>
    "tpu.trace_stop"() : () -> ()
    %35 = vector.shape_cast %34 : vector<2x8x8xf32> to vector<16x8xf32>
    %c0_14 = arith.constant 0 : index
    %c0_15 = arith.constant 0 : index
    %36 = vector.load %arg6[%c0_14, %c0_15] : memref<16x32xf32, #tpu.memory_space<vmem>>, vector<16x8xf32>
    tpu.vector_store %arg6[%c0_14, %c0_15], %35 {strides = array<i32>} : memref<16x32xf32, #tpu.memory_space<vmem>>, vector<16x8xf32>,
    %37 = vector.extract_strided_slice %8 {offsets = [0, 8], sizes = [16, 8], strides = [1, 1]} : vector<16x32xf32> to vector<16x8xf32>
    %38 = vector.shape_cast %37 : vector<16x8xf32> to vector<2x8x8xf32>
    %39 = arith.truncf %38 : vector<2x8x8xf32> to vector<2x8x8xbf16>
    %40 = vector.extract_strided_slice %9 {offsets = [0, 8], sizes = [16, 8], strides = [1, 1]} : vector<16x32xf32> to vector<16x8xf32>
    %41 = vector.shape_cast %40 : vector<16x8xf32> to vector<2x8x8xf32>
    %42 = arith.truncf %41 : vector<2x8x8xf32> to vector<2x8x8xbf16>
    %43 = vector.extract_strided_slice %10 {offsets = [0, 8], sizes = [16, 8], strides = [1, 1]} : vector<16x32xf32> to vector<16x8xf32>
    %44 = vector.shape_cast %43 : vector<16x8xf32> to vector<2x8x8xf32>
    %45 = arith.truncf %44 : vector<2x8x8xf32> to vector<2x8x8xbf16>
    "tpu.trace_start"() <{level = 10 : i32, message = "bnd,bmd->bnm"}> : () -> ()
    %cst_16 = arith.constant dense<0.000000e+00> : vector<2x8x8xf32>
    %46 = tpu.matmul %39, %42, %cst_16 {dimension_numbers = #tpu.dot_dimension_numbers<[2], [2], [1], [1], [0, 0, 0, 1, 1, 1], [0], [0]>} : vector<2x8x8xbf16>, vector<2x8x8xbf16>, vector<2x8x8xf32> -> vector<2x8x8xf32>
    "tpu.trace_stop"() : () -> ()
    %cst_17 = arith.constant dense<0xFF800000> : vector<2x8xf32>
    %47 = vector.multi_reduction <maximumf>, %46, %cst_17 [2] : vector<2x8x8xf32> to vector<2x8xf32>
    %48 = vector.shape_cast %47 : vector<2x8xf32> to vector<2x8x1xf32>
    %49 = vector.broadcast %48 : vector<2x8x1xf32> to vector<2x8x8xf32>
    %50 = arith.subf %46, %49 : vector<2x8x8xf32>
    %51 = math.exp %50 : vector<2x8x8xf32>
    %cst_18 = arith.constant dense<0.000000e+00> : vector<2x8xf32>
    %52 = vector.multi_reduction <add>, %51, %cst_18 [2] : vector<2x8x8xf32> to vector<2x8xf32>
    %53 = vector.shape_cast %52 : vector<2x8xf32> to vector<2x8x1xf32>
    %54 = vector.broadcast %53 : vector<2x8x1xf32> to vector<2x8x8xf32>
    %55 = arith.divf %51, %54 : vector<2x8x8xf32>
    %c0_19 = arith.constant 0 : index
    %c1 = arith.constant 1 : index
    %c0_20 = arith.constant 0 : index
    %c0_21 = arith.constant 0 : index
    %56 = vector.load %arg5[%c0_19, %c1, %c0_20, %c0_21] : memref<2x4x8x8xf32, #tpu.memory_space<vmem>>, vector<2x1x8x8xf32>
    %57 = vector.shape_cast %56 : vector<2x1x8x8xf32> to vector<2x8x8xf32>
    %58 = vector.shape_cast %55 : vector<2x8x8xf32> to vector<2x1x8x8xf32>
    tpu.vector_store %arg5[%c0_19, %c1, %c0_20, %c0_21], %58 {strides = array<i32>} : memref<2x4x8x8xf32, #tpu.memory_space<vmem>>, vector<2x1x8x8xf32>,
    %59 = arith.truncf %55 : vector<2x8x8xf32> to vector<2x8x8xbf16>
    "tpu.trace_start"() <{level = 10 : i32, message = "bnm,bmd->bnd"}> : () -> ()
    %cst_22 = arith.constant dense<0.000000e+00> : vector<2x8x8xf32>
    %60 = tpu.matmul %59, %45, %cst_22 {dimension_numbers = #tpu.dot_dimension_numbers<[2], [1], [1], [2], [0, 0, 0, 1, 1, 2], [0], [0]>} : vector<2x8x8xbf16>, vector<2x8x8xbf16>, vector<2x8x8xf32> -> vector<2x8x8xf32>
    "tpu.trace_stop"() : () -> ()
    %61 = vector.shape_cast %60 : vector<2x8x8xf32> to vector<16x8xf32>
    %c0_23 = arith.constant 0 : index
    %c8 = arith.constant 8 : index
    %62 = vector.load %arg6[%c0_23, %c8] : memref<16x32xf32, #tpu.memory_space<vmem>>, vector<16x8xf32>
    tpu.vector_store %arg6[%c0_23, %c8], %61 {strides = array<i32>} : memref<16x32xf32, #tpu.memory_space<vmem>>, vector<16x8xf32>,
    %63 = vector.extract_strided_slice %8 {offsets = [0, 16], sizes = [16, 8], strides = [1, 1]} : vector<16x32xf32> to vector<16x8xf32>
    %64 = vector.shape_cast %63 : vector<16x8xf32> to vector<2x8x8xf32>
    %65 = arith.truncf %64 : vector<2x8x8xf32> to vector<2x8x8xbf16>
    %66 = vector.extract_strided_slice %9 {offsets = [0, 16], sizes = [16, 8], strides = [1, 1]} : vector<16x32xf32> to vector<16x8xf32>
    %67 = vector.shape_cast %66 : vector<16x8xf32> to vector<2x8x8xf32>
    %68 = arith.truncf %67 : vector<2x8x8xf32> to vector<2x8x8xbf16>
    %69 = vector.extract_strided_slice %10 {offsets = [0, 16], sizes = [16, 8], strides = [1, 1]} : vector<16x32xf32> to vector<16x8xf32>
    %70 = vector.shape_cast %69 : vector<16x8xf32> to vector<2x8x8xf32>
    %71 = arith.truncf %70 : vector<2x8x8xf32> to vector<2x8x8xbf16>
    "tpu.trace_start"() <{level = 10 : i32, message = "bnd,bmd->bnm"}> : () -> ()
    %cst_24 = arith.constant dense<0.000000e+00> : vector<2x8x8xf32>
    %72 = tpu.matmul %65, %68, %cst_24 {dimension_numbers = #tpu.dot_dimension_numbers<[2], [2], [1], [1], [0, 0, 0, 1, 1, 1], [0], [0]>} : vector<2x8x8xbf16>, vector<2x8x8xbf16>, vector<2x8x8xf32> -> vector<2x8x8xf32>
    "tpu.trace_stop"() : () -> ()
    %cst_25 = arith.constant dense<0xFF800000> : vector<2x8xf32>
    %73 = vector.multi_reduction <maximumf>, %72, %cst_25 [2] : vector<2x8x8xf32> to vector<2x8xf32>
    %74 = vector.shape_cast %73 : vector<2x8xf32> to vector<2x8x1xf32>
    %75 = vector.broadcast %74 : vector<2x8x1xf32> to vector<2x8x8xf32>
    %76 = arith.subf %72, %75 : vector<2x8x8xf32>
    %77 = math.exp %76 : vector<2x8x8xf32>
    %cst_26 = arith.constant dense<0.000000e+00> : vector<2x8xf32>
    %78 = vector.multi_reduction <add>, %77, %cst_26 [2] : vector<2x8x8xf32> to vector<2x8xf32>
    %79 = vector.shape_cast %78 : vector<2x8xf32> to vector<2x8x1xf32>
    %80 = vector.broadcast %79 : vector<2x8x1xf32> to vector<2x8x8xf32>
    %81 = arith.divf %77, %80 : vector<2x8x8xf32>
    %c0_27 = arith.constant 0 : index
    %c2 = arith.constant 2 : index
    %c0_28 = arith.constant 0 : index
    %c0_29 = arith.constant 0 : index
    %82 = vector.load %arg5[%c0_27, %c2, %c0_28, %c0_29] : memref<2x4x8x8xf32, #tpu.memory_space<vmem>>, vector<2x1x8x8xf32>
    %83 = vector.shape_cast %82 : vector<2x1x8x8xf32> to vector<2x8x8xf32>
    %84 = vector.shape_cast %81 : vector<2x8x8xf32> to vector<2x1x8x8xf32>
    tpu.vector_store %arg5[%c0_27, %c2, %c0_28, %c0_29], %84 {strides = array<i32>} : memref<2x4x8x8xf32, #tpu.memory_space<vmem>>, vector<2x1x8x8xf32>,
    %85 = arith.truncf %81 : vector<2x8x8xf32> to vector<2x8x8xbf16>
    "tpu.trace_start"() <{level = 10 : i32, message = "bnm,bmd->bnd"}> : () -> ()
    %cst_30 = arith.constant dense<0.000000e+00> : vector<2x8x8xf32>
    %86 = tpu.matmul %85, %71, %cst_30 {dimension_numbers = #tpu.dot_dimension_numbers<[2], [1], [1], [2], [0, 0, 0, 1, 1, 2], [0], [0]>} : vector<2x8x8xbf16>, vector<2x8x8xbf16>, vector<2x8x8xf32> -> vector<2x8x8xf32>
    "tpu.trace_stop"() : () -> ()
    %87 = vector.shape_cast %86 : vector<2x8x8xf32> to vector<16x8xf32>
    %c0_31 = arith.constant 0 : index
    %c16 = arith.constant 16 : index
    %88 = vector.load %arg6[%c0_31, %c16] : memref<16x32xf32, #tpu.memory_space<vmem>>, vector<16x8xf32>
    tpu.vector_store %arg6[%c0_31, %c16], %87 {strides = array<i32>} : memref<16x32xf32, #tpu.memory_space<vmem>>, vector<16x8xf32>,
    %89 = vector.extract_strided_slice %8 {offsets = [0, 24], sizes = [16, 8], strides = [1, 1]} : vector<16x32xf32> to vector<16x8xf32>
    %90 = vector.shape_cast %89 : vector<16x8xf32> to vector<2x8x8xf32>
    %91 = arith.truncf %90 : vector<2x8x8xf32> to vector<2x8x8xbf16>
    %92 = vector.extract_strided_slice %9 {offsets = [0, 24], sizes = [16, 8], strides = [1, 1]} : vector<16x32xf32> to vector<16x8xf32>
    %93 = vector.shape_cast %92 : vector<16x8xf32> to vector<2x8x8xf32>
    %94 = arith.truncf %93 : vector<2x8x8xf32> to vector<2x8x8xbf16>
    %95 = vector.extract_strided_slice %10 {offsets = [0, 24], sizes = [16, 8], strides = [1, 1]} : vector<16x32xf32> to vector<16x8xf32>
    %96 = vector.shape_cast %95 : vector<16x8xf32> to vector<2x8x8xf32>
    %97 = arith.truncf %96 : vector<2x8x8xf32> to vector<2x8x8xbf16>
    "tpu.trace_start"() <{level = 10 : i32, message = "bnd,bmd->bnm"}> : () -> ()
    %cst_32 = arith.constant dense<0.000000e+00> : vector<2x8x8xf32>
    %98 = tpu.matmul %91, %94, %cst_32 {dimension_numbers = #tpu.dot_dimension_numbers<[2], [2], [1], [1], [0, 0, 0, 1, 1, 1], [0], [0]>} : vector<2x8x8xbf16>, vector<2x8x8xbf16>, vector<2x8x8xf32> -> vector<2x8x8xf32>
    "tpu.trace_stop"() : () -> ()
    %cst_33 = arith.constant dense<0xFF800000> : vector<2x8xf32>
    %99 = vector.multi_reduction <maximumf>, %98, %cst_33 [2] : vector<2x8x8xf32> to vector<2x8xf32>
    %100 = vector.shape_cast %99 : vector<2x8xf32> to vector<2x8x1xf32>
    %101 = vector.broadcast %100 : vector<2x8x1xf32> to vector<2x8x8xf32>
    %102 = arith.subf %98, %101 : vector<2x8x8xf32>
    %103 = math.exp %102 : vector<2x8x8xf32>
    %cst_34 = arith.constant dense<0.000000e+00> : vector<2x8xf32>
    %104 = vector.multi_reduction <add>, %103, %cst_34 [2] : vector<2x8x8xf32> to vector<2x8xf32>
    %105 = vector.shape_cast %104 : vector<2x8xf32> to vector<2x8x1xf32>
    %106 = vector.broadcast %105 : vector<2x8x1xf32> to vector<2x8x8xf32>
    %107 = arith.divf %103, %106 : vector<2x8x8xf32>
    %c0_35 = arith.constant 0 : index
    %c3 = arith.constant 3 : index
    %c0_36 = arith.constant 0 : index
    %c0_37 = arith.constant 0 : index
    %108 = vector.load %arg5[%c0_35, %c3, %c0_36, %c0_37] : memref<2x4x8x8xf32, #tpu.memory_space<vmem>>, vector<2x1x8x8xf32>
    %109 = vector.shape_cast %108 : vector<2x1x8x8xf32> to vector<2x8x8xf32>
    %110 = vector.shape_cast %107 : vector<2x8x8xf32> to vector<2x1x8x8xf32>
    tpu.vector_store %arg5[%c0_35, %c3, %c0_36, %c0_37], %110 {strides = array<i32>} : memref<2x4x8x8xf32, #tpu.memory_space<vmem>>, vector<2x1x8x8xf32>,
    %111 = arith.truncf %107 : vector<2x8x8xf32> to vector<2x8x8xbf16>
    "tpu.trace_start"() <{level = 10 : i32, message = "bnm,bmd->bnd"}> : () -> ()
    %cst_38 = arith.constant dense<0.000000e+00> : vector<2x8x8xf32>
    %112 = tpu.matmul %111, %97, %cst_38 {dimension_numbers = #tpu.dot_dimension_numbers<[2], [1], [1], [2], [0, 0, 0, 1, 1, 2], [0], [0]>} : vector<2x8x8xbf16>, vector<2x8x8xbf16>, vector<2x8x8xf32> -> vector<2x8x8xf32>
    "tpu.trace_stop"() : () -> ()
    %113 = vector.shape_cast %112 : vector<2x8x8xf32> to vector<16x8xf32>
    %c0_39 = arith.constant 0 : index
    %c24 = arith.constant 24 : index
    %114 = vector.load %arg6[%c0_39, %c24] : memref<16x32xf32, #tpu.memory_space<vmem>>, vector<16x8xf32>
    tpu.vector_store %arg6[%c0_39, %c24], %113 {strides = array<i32>} : memref<16x32xf32, #tpu.memory_space<vmem>>, vector<16x8xf32>,
    %c0_40 = arith.constant 0 : index
    %c0_41 = arith.constant 0 : index
    %115 = vector.load %arg6[%c0_40, %c0_41] : memref<16x32xf32, #tpu.memory_space<vmem>>, vector<16x32xf32>
    %c0_42 = arith.constant 0 : index
    %c0_43 = arith.constant 0 : index
    %116 = vector.load %arg4[%c0_42, %c0_43] : memref<16x32xf32, #tpu.memory_space<vmem>>, vector<16x32xf32>
    tpu.vector_store %arg4[%c0_42, %c0_43], %115 {strides = array<i32>} : memref<16x32xf32, #tpu.memory_space<vmem>>, vector<16x32xf32>,
    return
  }
  func.func @transform_0(%arg0: i32) -> (i32, i32) {
    %c0_i32 = arith.constant 0 : i32
    %c0_i32_0 = arith.constant 0 : i32
    return %arg0, %c0_i32 : i32, i32
  }
  func.func @transform_1(%arg0: i32) -> (i32, i32) {
    %c0_i32 = arith.constant 0 : i32
    %c0_i32_0 = arith.constant 0 : i32
    %c0_i32_1 = arith.constant 0 : i32
    return %c0_i32, %c0_i32_0 : i32, i32
  }
  func.func @transform_2(%arg0: i32) -> (i32, i32) {
    %c0_i32 = arith.constant 0 : i32
    %c0_i32_0 = arith.constant 0 : i32
    %c0_i32_1 = arith.constant 0 : i32
    return %c0_i32, %c0_i32_0 : i32, i32
  }
  func.func @transform_3(%arg0: i32) -> (i32, i32) {
    %c0_i32 = arith.constant 0 : i32
    %c0_i32_0 = arith.constant 0 : i32
    return %arg0, %c0_i32 : i32, i32
  }
  func.func @transform_4(%arg0: i32) -> (i32, i32, i32, i32) {
    %c0_i32 = arith.constant 0 : i32
    %c0_i32_0 = arith.constant 0 : i32
    %c0_i32_1 = arith.constant 0 : i32
    %c0_i32_2 = arith.constant 0 : i32
    return %arg0, %c0_i32, %c0_i32_0, %c0_i32_1 : i32, i32, i32, i32
  }
}

</mosaic_0001>

<bundles_post_ra>
// kernel: tpu_custom_call.1
= control target key start
LH: loop header
LB: loop body
LE: loop exit
PB: predicated region body
PF: predicated region fallthrough
CT: control target
= control target key end

     0   :  { %10 = vsyncpa [#allocation4], 0  ;;  %s1674_s0 = inlined_call_operand.hbm [shape: bf16[16,32], index: 0, kind: input, shape index: {}]   ;;  %s1675_s1 = inlined_call_operand.hbm [shape: bf16[32,96], index: 1, kind: input, shape index: {}]   ;;  %s1676_s2 = inlined_call_operand.vmem [shape: f32[1,96], index: 2, kind: input, shape index: {}]   ;;  %s1677_s3 = inlined_call_operand.hbm [shape: f32[16,32], index: 3, kind: output, shape index: {0}]   ;;  %s1678_s4 = inlined_call_operand.hbm [shape: f32[2,4,8,8], index: 4, kind: output, shape index: {1}]  }
   0x1   :  { %11 = vsyncpa [#allocation7], 0 }
   0x2   :  { %12 = vsyncpa [#allocation5], 0 }
   0x3   :  { %13 = vsyncpa [#allocation10], 0  ;;  %s1407_s15 = smov [#allocation3]   ;;  %s1311_s19 = scalar_lea.hbm %s1674_s0, 128 }
   0x4   :  { %s19_s16 = sshll.u32 %s1407_s15, 4  ;;  %p1312_p0 = scmp.ne.s32.totalorder %s1674_s0, %s1311_s19  ;;  %s20_s16 = int_to_ptr.vmem [resolvable:$true] %s19_s16 }
   0x5   :  { %p1315_p1 = scmp.lt.u32.totalorder %s1311_s19, %s1674_s0 }
   0x7   :  { %p1317_p2 = pnand %p1315_p1, %p1312_p0 }
   0x9   :  { %1320 = shalt.err (!%p1317_p2)
}
   0xa   :  { %s1321_s24 = scalar_lea.vmem %s20_s16, 128  ;;  %p1326_p4 = scmp.lt.s32.totalorder %s20_s16, %s20_s16 }
   0xb   :  { %p1322_p3 = scmp.ne.s32.totalorder %s20_s16, %s1321_s24  ;;  %p1327_p5 = scmp.lt.s32.totalorder %s1321_s24, %s1321_s24 }
   0xd   :  { %p1328_p6 = por %p1327_p5, %p1326_p4 }
   0xf   :  { %p1329_p7 = pnand %p1328_p6, %p1322_p3 }
  0x11   :  { %1332 = shalt.err (!%p1329_p7)
}
  0x12   :  { %s1408_s25 = smov 64   ;;  %s1409_s26 = smov 4  }
  0x13   :  { %25 = dma.hbm_to_vmem [thread:$0]  %s1674_s0, 128, %s20_s16, [#allocation4], %s1408_s25, %s1408_s25, %s1409_s26  }
  0x14   :  { %s1410_s29 = smov [#allocation6]   ;;  %s1333_s7 = scalar_lea.hbm %s1675_s1, 256 }
  0x15   :  { %s31_s30 = sshll.u32 %s1410_s29, 4  ;;  %p1334_p8 = scmp.ne.s32.totalorder %s1675_s1, %s1333_s7  ;;  %s32_s30 = int_to_ptr.vmem [resolvable:$true] %s31_s30 }
  0x16   :  { %p1337_p9 = scmp.lt.u32.totalorder %s1333_s7, %s1675_s1 }
  0x18   :  { %p1339_p10 = pnand %p1337_p9, %p1334_p8 }
  0x1a   :  { %1342 = shalt.err (!%p1339_p10)
}
  0x1b   :  { %s1343_s12 = scalar_lea.vmem %s32_s30, 256  ;;  %p1348_p12 = scmp.lt.s32.totalorder %s32_s30, %s32_s30 }
  0x1c   :  { %p1344_p11 = scmp.ne.s32.totalorder %s32_s30, %s1343_s12  ;;  %p1349_p13 = scmp.lt.s32.totalorder %s1343_s12, %s1343_s12 }
  0x1e   :  { %p1350_p0 = por %p1349_p13, %p1348_p12 }
  0x20   :  { %p1351_p1 = pnand %p1350_p0, %p1344_p11 }
  0x22   :  { %1354 = shalt.err (!%p1351_p1)
}
  0x23   :  { %37 = dma.hbm_to_vmem [thread:$0]  %s1675_s1, 256, %s32_s30, [#allocation7], %s1408_s25, %s1408_s25, %s1409_s26  }
  0x24   :  { %1399 = dma.done.wait [#allocation4], 128  }
  0x25   :  { %1400 = vsyncadd [#allocation4], 4294967168 }
  0x26   :  { %1401 = dma.done.wait [#allocation7], 256  }
  0x27   :  { %1402 = vsyncadd [#allocation7], 4294967040  ;;  %v1411_v0 = vmov 0.0   ;;  %vm1412_vm0 = vmmov 0   ;;  %v1276_v1 = vld [vmem:[#allocation6] sm:$0xff]   ;;  %v1277_v2 = vld [vmem:[#allocation6 + $0x8] sm:$0xff]  }
  0x28   :  { %1150 = vmatprep.subr.bf16.mxu0 %v1411_v0  ;;  %1154 = vmatprep.mubr.msk.bf16.mxu0 %vm1412_vm0, %v1411_v0  ;;  %v1278_v3 = vld [vmem:[#allocation3] sm:$0xff]   ;;  %vm77_vm1 = vcmask 261120   ;;  %v1094_v4 = vld [vmem:[%s1676_s2] ss:$0 sm:$0xff]  ;;  %s1413_s15 = smov 96   ;;  %vm131_vm2 = vcmask 64512  }
  0x29   :  { %1158 = vmatprep.subr.bf16.mxu1 %v1411_v0  ;;  %1160 = vmatprep.mubr.msk.bf16.mxu1 %vm1412_vm0, %v1411_v0  ;;  %s1414_s2 = smov 88   ;;  %vm258_vm3 = vcmask 1043456   ;;  %s1415_s16 = smov 120   ;;  %vm585_vm4 = vcmask 130112   ;;  %vm819_vm5 = vcmask 195712  }
  0x2a   :  { %1151 = vmatpush3.bf16.msra.mxu0 %v1276_v1  ;;  %s1416_s17 = smov 56   ;;  %s1417_s18 = smov 80  }
  0x2b   :  { %1152 = vmatprep.subr.bf16.mxu0 %v1411_v0  ;;  %s1418_s19 = smov 112   ;;  %s1419_s20 = smov 48  }
  0x2c   :  { %s1420_s21 = smov 72   ;;  %s1421_s22 = smov 104  }
  0x2d   :  { %s1422_s23 = smov 40   ;;  %s1423_s24 = smov 8  }
  0x2e   :  { %1153 = vmatpush3.bf16.msra.mxu0 %v1277_v2  ;;  %s1425_s26 = smov 24   ;;  %s1426_s27 = smov [#allocation9]  }
  0x2f   :  { %1164 = vmatprep.subr.bf16.mxu0 %v1411_v0  ;;  %s1077_s28 = sshll.u32 %s1426_s27, 4  ;;  %s1078_s28 = int_to_ptr.vmem [resolvable:$true] %s1077_s28 }
  0x30   :  { %s1355_s29 = scalar_lea.vmem %s1078_s28, 1024  ;;  %p1360_p3 = scmp.lt.s32.totalorder %s1078_s28, %s1078_s28 }
  0x31   :  { %1155 = vmatmul.mubr.msk.bf16.vlgmr.msra.gmra.mrb[0].mxu0 %vm77_vm1, %v1278_v3  ;;  %p1356_p2 = scmp.ne.s32.totalorder %s1078_s28, %s1355_s29  ;;  %p1361_p4 = scmp.lt.s32.totalorder %s1355_s29, %s1355_s29 }
  0x32   :  { %1166 = vmatprep.mubr.msk.bf16.mxu0 %vm1412_vm0, %v1411_v0 }
  0x33   :  { %p1362_p5 = por %p1361_p4, %p1360_p3 }
  0x35   :  { %p1363_p6 = pnand %p1362_p5, %p1356_p2 }
 0x104   :  { %v115_v5 = vpop.f32.mrb[0].mxu0 }
 0x105   :  { %v116_v6 = vadd.f32 %v1094_v4, %v115_v5  ;;  %v1156_v7 = vpop.f32.mrb[1].mxu0 }
 0x106   :  { %v118_v8 = vpop.f32.mrb[2].mxu0 }
 0x107   :  { %v1496_v9 = vpack.c.bf16 %v116_v6, %v116_v6  ;;  %v119_v10 = vadd.f32 %v1094_v4, %v118_v8  ;;  %v1157_v11 = vpop.f32.mrb[3].mxu0  ;;  %v122_v15 = vmul.f32 0.35355338, %v116_v6 }
 0x109   :  { %129 = vrot.lane.b32.xlu0 %v1496_v9, %s1413_s15  ;;  %v1499_v12 = vpack.c.bf16 %v119_v10, %v119_v10  ;;  %v1505_v18 = vpack.c.bf16 %v122_v15, %v122_v15  ;;  %v123_v19 = vmul.f32 0.35355338, %v119_v10 }
 0x10b   :  { %v1512_v20 = vpack.c.bf16 %v123_v19, %v123_v19 }
 0x10d   :  { %179 = vrot.lane.b32.xlu0 %v1499_v12, %s1413_s15 }
 0x17b   :  { %v130_v13 = vpop.permute.xlu0 %129 }
 0x17c   :  { %v136_v14 = vsel %vm131_vm2, %v130_v13, 0 }
 0x17d   :  { %1159 = vmatpush3.bf16.xpose.msra.mxu1 %v136_v14 }
 0x17e   :  { %1170 = vmatprep.subr.bf16.mxu1 %v1411_v0 }
 0x17f   :  { %v180_v16 = vpop.permute.xlu0 %179 }
 0x180   :  { %v185_v17 = vsel %vm131_vm2, %v180_v16, 0 }
 0x181   :  { %1165 = vmatpush3.bf16.xpose.msra.mxu0 %v185_v17 }
 0x182   :  { %1176 = vmatprep.subr.bf16.mxu0 %v1411_v0 }
 0x184   :  { %1161 = vmatmul.mubr.msk.bf16.vlgmr.msra.gmra.mrb[0].mxu1 %vm131_vm2, %v1505_v18 }
 0x185   :  { %1172 = vmatprep.mubr.msk.bf16.mxu1 %vm1412_vm0, %v1411_v0 }
 0x188   :  { %1167 = vmatmul.mubr.msk.bf16.vlgmr.msra.gmra.mrb[4].mxu0 %vm131_vm2, %v1512_v20 }
 0x189   :  { %1178 = vmatprep.mubr.msk.bf16.mxu0 %vm1412_vm0, %v1411_v0 }
 0x257   :  { %v172_v21 = vpop.f32.mrb[0].mxu1 }
 0x258   :  { %v1162_v22 = vpop.f32.mrb[1].mxu1  ;;  %v227_v23 = vsel %vm131_vm2, %v172_v21, -inf }
 0x259   :  { %228 = vmax.xlane.f32.xlu1 %v227_v23  ;;  %v175_v24 = vpop.f32.mrb[2].mxu1 }
 0x25a   :  { %v1163_v25 = vpop.f32.mrb[3].mxu1 }
 0x25b   :  { %v221_v26 = vpop.f32.mrb[4].mxu0 }
 0x25c   :  { %v1168_v27 = vpop.f32.mrb[5].mxu0  ;;  %v230_v28 = vsel %vm131_vm2, %v221_v26, -inf }
 0x25d   :  { %231 = vmax.xlane.f32.xlu1 %v230_v28  ;;  %v224_v29 = vpop.f32.mrb[6].mxu0 }
 0x25e   :  { %v1169_v30 = vpop.f32.mrb[7].mxu0 }
 0x26e   :  { %253 = vrot.lane.b32.xlu1 %v1496_v9, %s1408_s25 }
 0x272   :  { %302 = vrot.lane.b32.xlu1 %v1499_v12, %s1408_s25  ;;  %s1424_s25 = smov 16  }
 0x276   :  { %355 = vrot.lane.b32.xlu1 %v1496_v9, %s1414_s2 }
 0x2e6   :  { %v229_v31 = vpop.xlane.xlu1 %228 }
 0x2e7   :  { %v233_v32 = vsub.f32 %v172_v21, %v229_v31 }
 0x2e9   :  { %v235_v33 = vmul.f32 1.442695, %v233_v32 }
 0x2ea   :  { %v232_v34 = vpop.xlane.xlu1 %231 }
 0x2eb   :  { %1279 = vpow2.f32 %v235_v33  ;;  %v234_v35 = vsub.f32 %v221_v26, %v232_v34 }
 0x2ed   :  { %v237_v36 = vmul.f32 1.442695, %v234_v35 }
 0x2ee   :  { %v254_v37 = vpop.permute.xlu1 %253 }
 0x2ef   :  { %1281 = vpow2.f32 %v237_v36  ;;  %v260_v38 = vsel %vm258_vm3, %v254_v37, 0 }
 0x2f0   :  { %1171 = vmatpush3.bf16.msra.mxu1 %v260_v38 }
 0x2f1   :  { %1182 = vmatprep.subr.bf16.mxu1 %v1411_v0 }
 0x2f2   :  { %v303_v39 = vpop.permute.xlu1 %302 }
 0x2f3   :  { %v308_v40 = vsel %vm258_vm3, %v303_v39, 0 }
 0x2f4   :  { %1177 = vmatpush3.bf16.msra.mxu0 %v308_v40 }
 0x2f5   :  { %v1280_v41 = vpop.eup %1279  ;;  %1188 = vmatprep.subr.bf16.mxu0 %v1411_v0 }
 0x2f6   :  { %v239_v42 = vsel %vm131_vm2, %v1280_v41, 0.0  ;;  %v356_v45 = vpop.permute.xlu1 %355 }
 0x2f7   :  { %240 = vadd.xlane.f32.xlu0 %v239_v42  ;;  %v361_v52 = vsel %vm131_vm2, %v356_v45, 0 }
 0x2f9   :  { %v1282_v43 = vpop.eup %1281 }
 0x2fa   :  { %v242_v44 = vsel %vm131_vm2, %v1282_v43, 0.0 }
 0x2fb   :  { %243 = vadd.xlane.f32.xlu1 %v242_v44 }
 0x30c   :  { %406 = vrot.lane.b32.xlu1 %v1499_v12, %s1414_s2 }
 0x30d   :  { %353 = vrot.lane.b32.xlu0 %v1505_v18, %s1415_s16 }
 0x310   :  { %404 = vrot.lane.b32.xlu1 %v1512_v20, %s1415_s16 }
 0x384   :  { %v241_v46 = vpop.xlane.xlu0 %240 }
 0x385   :  { %1283 = vrcp.f32 %v241_v46 }
 0x388   :  { %v244_v47 = vpop.xlane.xlu1 %243  ;;  %v354_v57 = vpop.permute.xlu0 %353 }
 0x389   :  { %1285 = vrcp.f32 %v244_v47 }
 0x38c   :  { %v407_v54 = vpop.permute.xlu1 %406 }
 0x38d   :  { %v412_v56 = vsel %vm131_vm2, %v407_v54, 0 }
 0x38f   :  { %v1284_v48 = vpop.eup %1283 }
 0x390   :  { %v246_v49 = vmul.f32 %v1284_v48, %v1280_v41  ;;  %v405_v58 = vpop.permute.xlu1 %404 }
 0x392   :  { %249 = vst.msk [vmem:[#allocation9] sm:$0xff] %vm131_vm2, %v246_v49  ;;  %v251_v50 = vpack.c.bf16 %v246_v49, %v246_v49 }
 0x393   :  { %v1286_v51 = vpop.eup %1285 }
 0x394   :  { %v248_v53 = vmul.f32 %v1286_v51, %v1282_v43  ;;  %1173 = vmatmul.mubr.msk.bf16.vlgmr.msra.gmra.mrb[4].mxu1 %vm131_vm2, %v251_v50 }
 0x395   :  { %1183 = vmatpush3.bf16.xpose.msra.mxu1 %v361_v52  ;;  %1184 = vmatprep.mubr.msk.bf16.mxu1 %vm1412_vm0, %v1411_v0 }
 0x396   :  { %250 = vst.msk [vmem:[#allocation9 + $0x20] sm:$0xff] %vm131_vm2, %v248_v53  ;;  %v252_v55 = vpack.c.bf16 %v248_v53, %v248_v53  ;;  %1194 = vmatprep.subr.bf16.mxu1 %v1411_v0 }
 0x398   :  { %1179 = vmatmul.mubr.msk.bf16.vlgmr.msra.gmra.mrb[8].mxu0 %vm131_vm2, %v252_v55 }
 0x399   :  { %1189 = vmatpush3.bf16.xpose.msra.mxu0 %v412_v56  ;;  %1190 = vmatprep.mubr.msk.bf16.mxu0 %vm1412_vm0, %v1411_v0 }
 0x39a   :  { %1200 = vmatprep.subr.bf16.mxu0 %v1411_v0 }
 0x39c   :  { %1185 = vmatmul.mubr.msk.bf16.vlgmr.msra.gmra.mrb[8].mxu1 %vm131_vm2, %v354_v57 }
 0x39d   :  { %1196 = vmatprep.mubr.msk.bf16.mxu1 %vm1412_vm0, %v1411_v0 }
 0x3a0   :  { %1191 = vmatmul.mubr.msk.bf16.vlgmr.msra.gmra.mrb[12].mxu0 %vm131_vm2, %v405_v58 }
 0x3a1   :  { %1202 = vmatprep.mubr.msk.bf16.mxu0 %vm1412_vm0, %v1411_v0 }
 0x467   :  { %v296_v59 = vpop.f32.mrb[4].mxu1 }
 0x468   :  { %350 = vst.msk [vmem:[#allocation2] sm:$0xff] %vm131_vm2, %v296_v59  ;;  %v1174_v60 = vpop.f32.mrb[5].mxu1 }
 0x469   :  { %v299_v61 = vpop.f32.mrb[6].mxu1 }
 0x46a   :  { %v1175_v62 = vpop.f32.mrb[7].mxu1 }
 0x46b   :  { %v344_v63 = vpop.f32.mrb[8].mxu0 }
 0x46c   :  { %351 = vst.msk [vmem:[#allocation2 + $0x8] sm:$0xff] %vm131_vm2, %v344_v63  ;;  %v1180_v1 = vpop.f32.mrb[9].mxu0 }
 0x46d   :  { %v347_v2 = vpop.f32.mrb[10].mxu0 }
 0x46e   :  { %v1181_v3 = vpop.f32.mrb[11].mxu0 }
 0x46f   :  { %v397_v4 = vpop.f32.mrb[8].mxu1 }
 0x470   :  { %v1186_v5 = vpop.f32.mrb[9].mxu1  ;;  %v454_v6 = vsel %vm131_vm2, %v397_v4, -inf }
 0x471   :  { %455 = vmax.xlane.f32.xlu1 %v454_v6  ;;  %v400_v7 = vpop.f32.mrb[10].mxu1 }
 0x472   :  { %v1187_v8 = vpop.f32.mrb[11].mxu1 }
 0x473   :  { %v448_v10 = vpop.f32.mrb[12].mxu0 }
 0x474   :  { %v1192_v11 = vpop.f32.mrb[13].mxu0  ;;  %v457_v13 = vsel %vm131_vm2, %v448_v10, -inf }
 0x475   :  { %458 = vmax.xlane.f32.xlu0 %v457_v13  ;;  %v451_v14 = vpop.f32.mrb[14].mxu0 }
 0x476   :  { %v1193_v15 = vpop.f32.mrb[15].mxu0 }
 0x482   :  { %481 = vrot.lane.b32.xlu1 %v1496_v9, %s1416_s17 }
 0x486   :  { %590 = vrot.lane.b32.xlu1 %v1496_v9, %s1417_s18 }
 0x48b   :  { %529 = vrot.lane.b32.xlu0 %v1499_v12, %s1416_s17 }
 0x48f   :  { %588 = vrot.lane.b32.xlu0 %v1505_v18, %s1418_s19 }
 0x4fe   :  { %v456_v16 = vpop.xlane.xlu1 %455 }
 0x4ff   :  { %v460_v17 = vsub.f32 %v397_v4, %v456_v16 }
 0x501   :  { %v462_v19 = vmul.f32 1.442695, %v460_v17 }
 0x502   :  { %v482_v21 = vpop.permute.xlu1 %481  ;;  %v459_v22 = vpop.xlane.xlu0 %458 }
 0x503   :  { %1287 = vpow2.f32 %v462_v19  ;;  %v487_v23 = vsel %vm258_vm3, %v482_v21, 0  ;;  %v461_v24 = vsub.f32 %v448_v10, %v459_v22 }
 0x504   :  { %1195 = vmatpush3.bf16.msra.mxu1 %v487_v23 }
 0x505   :  { %v464_v25 = vmul.f32 1.442695, %v461_v24  ;;  %1206 = vmatprep.subr.bf16.mxu1 %v1411_v0 }
 0x506   :  { %v530_v26 = vpop.permute.xlu0 %529  ;;  %v591_v32 = vpop.permute.xlu1 %590 }
 0x507   :  { %1289 = vpow2.f32 %v464_v25  ;;  %v535_v27 = vsel %vm258_vm3, %v530_v26, 0  ;;  %v596_v39 = vsel %vm131_vm2, %v591_v32, 0 }
 0x508   :  { %1201 = vmatpush3.bf16.msra.mxu0 %v535_v27 }
 0x509   :  { %1212 = vmatprep.subr.bf16.mxu0 %v1411_v0 }
 0x50a   :  { %v589_v44 = vpop.permute.xlu0 %588 }
 0x50d   :  { %v1288_v28 = vpop.eup %1287 }
 0x50e   :  { %v466_v29 = vsel %vm131_vm2, %v1288_v28, 0.0 }
 0x50f   :  { %467 = vadd.xlane.f32.xlu1 %v466_v29 }
 0x511   :  { %v1290_v30 = vpop.eup %1289 }
 0x512   :  { %v469_v31 = vsel %vm131_vm2, %v1290_v30, 0.0 }
 0x513   :  { %470 = vadd.xlane.f32.xlu1 %v469_v31 }
 0x524   :  { %640 = vrot.lane.b32.xlu1 %v1499_v12, %s1417_s18 }
 0x528   :  { %638 = vrot.lane.b32.xlu1 %v1512_v20, %s1418_s19 }
 0x59c   :  { %v468_v33 = vpop.xlane.xlu1 %467 }
 0x59d   :  { %1291 = vrcp.f32 %v468_v33 }
 0x5a0   :  { %v471_v34 = vpop.xlane.xlu1 %470 }
 0x5a1   :  { %1293 = vrcp.f32 %v471_v34 }
 0x5a4   :  { %v641_v41 = vpop.permute.xlu1 %640 }
 0x5a5   :  { %v646_v43 = vsel %vm131_vm2, %v641_v41, 0 }
 0x5a7   :  { %v1292_v35 = vpop.eup %1291 }
 0x5a8   :  { %v473_v36 = vmul.f32 %v1292_v35, %v1288_v28  ;;  %v639_v45 = vpop.permute.xlu1 %638 }
 0x5aa   :  { %477 = vst.msk [vmem:[#allocation9 + $0x8] sm:$0xff] %vm131_vm2, %v473_v36  ;;  %v479_v37 = vpack.c.bf16 %v473_v36, %v473_v36 }
 0x5ab   :  { %v1294_v38 = vpop.eup %1293 }
 0x5ac   :  { %v475_v40 = vmul.f32 %v1294_v38, %v1290_v30  ;;  %1197 = vmatmul.mubr.msk.bf16.vlgmr.msra.gmra.mrb[12].mxu1 %vm131_vm2, %v479_v37 }
 0x5ad   :  { %1207 = vmatpush3.bf16.xpose.msra.mxu1 %v596_v39  ;;  %1208 = vmatprep.mubr.msk.bf16.mxu1 %vm1412_vm0, %v1411_v0 }
 0x5ae   :  { %478 = vst.msk [vmem:[#allocation9 + $0x28] sm:$0xff] %vm131_vm2, %v475_v40  ;;  %v480_v42 = vpack.c.bf16 %v475_v40, %v475_v40  ;;  %1218 = vmatprep.subr.bf16.mxu1 %v1411_v0 }
 0x5b0   :  { %1203 = vmatmul.mubr.msk.bf16.vlgmr.msra.gmra.mrb[16].mxu0 %vm131_vm2, %v480_v42 }
 0x5b1   :  { %1213 = vmatpush3.bf16.xpose.msra.mxu0 %v646_v43  ;;  %1214 = vmatprep.mubr.msk.bf16.mxu0 %vm1412_vm0, %v1411_v0 }
 0x5b2   :  { %1224 = vmatprep.subr.bf16.mxu0 %v1411_v0 }
 0x5b4   :  { %1209 = vmatmul.mubr.msk.bf16.vlgmr.msra.gmra.mrb[16].mxu1 %vm131_vm2, %v589_v44 }
 0x5b5   :  { %1220 = vmatprep.mubr.msk.bf16.mxu1 %vm1412_vm0, %v1411_v0 }
 0x5b8   :  { %1215 = vmatmul.mubr.msk.bf16.vlgmr.msra.gmra.mrb[20].mxu0 %vm131_vm2, %v639_v45 }
 0x5b9   :  { %1226 = vmatprep.mubr.msk.bf16.mxu0 %vm1412_vm0, %v1411_v0 }
 0x67f   :  { %v1586_v46 = vpop.f32.mrb[12].mxu1 }
 0x680   :  { %v1198_v47 = vpop.f32.mrb[13].mxu1 }
 0x681   :  { %v526_v48 = vpop.f32.mrb[14].mxu1 }
 0x682   :  { %v1199_v49 = vpop.f32.mrb[15].mxu1 }
 0x683   :  { %v1588_v50 = vpop.f32.mrb[16].mxu0 }
 0x684   :  { %v1204_v51 = vpop.f32.mrb[17].mxu0 }
 0x685   :  { %v574_v52 = vpop.f32.mrb[18].mxu0 }
 0x686   :  { %v1205_v53 = vpop.f32.mrb[19].mxu0 }
 0x687   :  { %v632_v54 = vpop.f32.mrb[16].mxu1 }
 0x688   :  { %v1210_v55 = vpop.f32.mrb[17].mxu1  ;;  %v688_v56 = vsel %vm131_vm2, %v632_v54, -inf }
 0x689   :  { %689 = vmax.xlane.f32.xlu0 %v688_v56  ;;  %v635_v57 = vpop.f32.mrb[18].mxu1 }
 0x68a   :  { %v1211_v58 = vpop.f32.mrb[19].mxu1 }
 0x68b   :  { %v682_v59 = vpop.f32.mrb[20].mxu0 }
 0x68c   :  { %v1216_v60 = vpop.f32.mrb[21].mxu0  ;;  %v691_v61 = vsel %vm131_vm2, %v682_v59, -inf }
 0x68d   :  { %692 = vmax.xlane.f32.xlu1 %v691_v61  ;;  %v685_v62 = vpop.f32.mrb[22].mxu0 }
 0x68e   :  { %v1217_v63 = vpop.f32.mrb[23].mxu0 }
 0x69e   :  { %715 = vrot.lane.b32.xlu1 %v1496_v9, %s1419_s20 }
 0x6a2   :  { %824 = vrot.lane.b32.xlu1 %v1496_v9, %s1420_s21 }
 0x6a6   :  { %874 = vrot.lane.b32.xlu1 %v1499_v12, %s1420_s21 }
 0x6aa   :  { %872 = vrot.lane.b32.xlu1 %v1512_v20, %s1421_s22 }
 0x716   :  { %v690_v1 = vpop.xlane.xlu0 %689 }
 0x717   :  { %v694_v2 = vsub.f32 %v632_v54, %v690_v1 }
 0x719   :  { %v696_v3 = vmul.f32 1.442695, %v694_v2 }
 0x71a   :  { %v693_v4 = vpop.xlane.xlu1 %692 }
 0x71b   :  { %1295 = vpow2.f32 %v696_v3  ;;  %v695_v5 = vsub.f32 %v682_v59, %v693_v4 }
 0x71d   :  { %v698_v6 = vmul.f32 1.442695, %v695_v5 }
 0x71e   :  { %v716_v7 = vpop.permute.xlu1 %715 }
 0x71f   :  { %1297 = vpow2.f32 %v698_v6  ;;  %v721_v8 = vsel %vm258_vm3, %v716_v7, 0 }
 0x720   :  { %1219 = vmatpush3.bf16.msra.mxu1 %v721_v8 }
 0x721   :  { %1230 = vmatprep.subr.bf16.mxu1 %v1411_v0 }
 0x722   :  { %v825_v21 = vpop.permute.xlu1 %824 }
 0x723   :  { %v830_v25 = vsel %vm131_vm2, %v825_v21, 0 }
 0x725   :  { %v1296_v10 = vpop.eup %1295 }
 0x726   :  { %v700_v11 = vsel %vm131_vm2, %v1296_v10, 0.0  ;;  %v875_v26 = vpop.permute.xlu1 %874 }
 0x727   :  { %701 = vadd.xlane.f32.xlu0 %v700_v11  ;;  %v880_v28 = vsel %vm131_vm2, %v875_v26, 0 }
 0x729   :  { %v1298_v13 = vpop.eup %1297 }
 0x72a   :  { %v703_v20 = vsel %vm131_vm2, %v1298_v13, 0.0  ;;  %v873_v30 = vpop.permute.xlu1 %872 }
 0x72b   :  { %704 = vadd.xlane.f32.xlu0 %v703_v20 }
 0x741   :  { %763 = vrot.lane.b32.xlu0 %v1499_v12, %s1419_s20 }
 0x745   :  { %822 = vrot.lane.b32.xlu0 %v1505_v18, %s1421_s22 }
 0x7b4   :  { %v702_v14 = vpop.xlane.xlu0 %701 }
 0x7b5   :  { %1299 = vrcp.f32 %v702_v14 }
 0x7b8   :  { %v705_v15 = vpop.xlane.xlu0 %704 }
 0x7b9   :  { %1301 = vrcp.f32 %v705_v15 }
 0x7bc   :  { %v764_v16 = vpop.permute.xlu0 %763 }
 0x7bd   :  { %v769_v17 = vsel %vm258_vm3, %v764_v16, 0 }
 0x7be   :  { %1225 = vmatpush3.bf16.msra.mxu0 %v769_v17 }
 0x7bf   :  { %v1300_v19 = vpop.eup %1299  ;;  %1236 = vmatprep.subr.bf16.mxu0 %v1411_v0 }
 0x7c0   :  { %v707_v22 = vmul.f32 %v1300_v19, %v1296_v10  ;;  %v823_v29 = vpop.permute.xlu0 %822 }
 0x7c2   :  { %711 = vst.msk [vmem:[#allocation9 + $0x10] sm:$0xff] %vm131_vm2, %v707_v22  ;;  %v713_v23 = vpack.c.bf16 %v707_v22, %v707_v22 }
 0x7c3   :  { %v1302_v24 = vpop.eup %1301 }
 0x7c4   :  { %v709_v18 = vmul.f32 %v1302_v24, %v1298_v13  ;;  %1221 = vmatmul.mubr.msk.bf16.vlgmr.msra.gmra.mrb[20].mxu1 %vm131_vm2, %v713_v23 }
 0x7c5   :  { %1231 = vmatpush3.bf16.xpose.msra.mxu1 %v830_v25  ;;  %1232 = vmatprep.mubr.msk.bf16.mxu1 %vm1412_vm0, %v1411_v0 }
 0x7c6   :  { %712 = vst.msk [vmem:[#allocation9 + $0x30] sm:$0xff] %vm131_vm2, %v709_v18  ;;  %v714_v27 = vpack.c.bf16 %v709_v18, %v709_v18  ;;  %1242 = vmatprep.subr.bf16.mxu1 %v1411_v0 }
 0x7c8   :  { %1227 = vmatmul.mubr.msk.bf16.vlgmr.msra.gmra.mrb[24].mxu0 %vm131_vm2, %v714_v27 }
 0x7c9   :  { %1237 = vmatpush3.bf16.xpose.msra.mxu0 %v880_v28  ;;  %1238 = vmatprep.mubr.msk.bf16.mxu0 %vm1412_vm0, %v1411_v0 }
 0x7ca   :  { %1248 = vmatprep.subr.bf16.mxu0 %v1411_v0 }
 0x7cc   :  { %1233 = vmatmul.mubr.msk.bf16.vlgmr.msra.gmra.mrb[24].mxu1 %vm131_vm2, %v823_v29 }
 0x7cd   :  { %1244 = vmatprep.mubr.msk.bf16.mxu1 %vm1412_vm0, %v1411_v0 }
 0x7d0   :  { %1239 = vmatmul.mubr.msk.bf16.vlgmr.msra.gmra.mrb[28].mxu0 %vm131_vm2, %v873_v30 }
 0x7d1   :  { %1250 = vmatprep.mubr.msk.bf16.mxu0 %vm1412_vm0, %v1411_v0 }
 0x897   :  { %v757_v31 = vpop.f32.mrb[20].mxu1 }
 0x898   :  { %v1222_v32 = vpop.f32.mrb[21].mxu1 }
 0x899   :  { %v760_v33 = vpop.f32.mrb[22].mxu1 }
 0x89a   :  { %v1223_v34 = vpop.f32.mrb[23].mxu1 }
 0x89b   :  { %v805_v35 = vpop.f32.mrb[24].mxu0 }
 0x89c   :  { %v1228_v36 = vpop.f32.mrb[25].mxu0 }
 0x89d   :  { %v808_v37 = vpop.f32.mrb[26].mxu0 }
 0x89e   :  { %v1229_v38 = vpop.f32.mrb[27].mxu0 }
 0x89f   :  { %v866_v39 = vpop.f32.mrb[24].mxu1 }
 0x8a0   :  { %v1234_v40 = vpop.f32.mrb[25].mxu1  ;;  %v922_v41 = vsel %vm131_vm2, %v866_v39, -inf }
 0x8a1   :  { %923 = vmax.xlane.f32.xlu0 %v922_v41  ;;  %v869_v42 = vpop.f32.mrb[26].mxu1 }
 0x8a2   :  { %v1235_v43 = vpop.f32.mrb[27].mxu1 }
 0x8a3   :  { %v916_v44 = vpop.f32.mrb[28].mxu0 }
 0x8a4   :  { %v1240_v45 = vpop.f32.mrb[29].mxu0  ;;  %v925_v47 = vsel %vm131_vm2, %v916_v44, -inf }
 0x8a5   :  { %926 = vmax.xlane.f32.xlu1 %v925_v47  ;;  %v919_v0 = vpop.f32.mrb[30].mxu0 }
 0x8a6   :  { %v1241_v48 = vpop.f32.mrb[31].mxu0 }
 0x8b6   :  { %949 = vrot.lane.b32.xlu1 %v1496_v9, %s1422_s23 }
 0x8ba   :  { %579 = vrot.lane.b32.xlu1 %v1586_v46, %s1423_s24 }
 0x8be   :  { %581 = vrot.lane.b32.xlu1 %v1588_v50, %s1423_s24 }
 0x8c2   :  { %815 = vrot.lane.b32.xlu1 %v805_v35, %s1424_s25 }
 0x92e   :  { %v924_v49 = vpop.xlane.xlu0 %923 }
 0x92f   :  { %v928_v51 = vsub.f32 %v866_v39, %v924_v49 }
 0x931   :  { %v930_v52 = vmul.f32 1.442695, %v928_v51 }
 0x932   :  { %v927_v53 = vpop.xlane.xlu1 %926 }
 0x933   :  { %1303 = vpow2.f32 %v930_v52  ;;  %v929_v54 = vsub.f32 %v916_v44, %v927_v53 }
 0x935   :  { %v932_v55 = vmul.f32 1.442695, %v929_v54 }
 0x936   :  { %v950_v56 = vpop.permute.xlu1 %949 }
 0x937   :  { %1305 = vpow2.f32 %v932_v55  ;;  %v955_v9 = vsel %vm258_vm3, %v950_v56, 0 }
 0x938   :  { %1243 = vmatpush3.bf16.msra.mxu1 %v955_v9 }
 0x93a   :  { %v580_v57 = vpop.permute.xlu1 %579 }
 0x93b   :  { %586 = vst.msk [vmem:[#allocation2] sm:$0xff] %vm585_vm4, %v580_v57 }
 0x93d   :  { %v1304_v46 = vpop.eup %1303 }
 0x93e   :  { %v582_v58 = vpop.permute.xlu1 %581  ;;  %v934_v50 = vsel %vm131_vm2, %v1304_v46, 0.0 }
 0x93f   :  { %587 = vst.msk [vmem:[#allocation2 + $0x8] sm:$0xff] %vm585_vm4, %v582_v58  ;;  %935 = vadd.xlane.f32.xlu0 %v934_v50 }
 0x941   :  { %v1306_v59 = vpop.eup %1305 }
 0x942   :  { %v816_v60 = vpop.permute.xlu1 %815  ;;  %v937_v61 = vsel %vm131_vm2, %v1306_v59, 0.0 }
 0x943   :  { %821 = vst.msk [vmem:[#allocation2 + $0x8] sm:$0xff] %vm819_vm5, %v816_v60  ;;  %938 = vadd.xlane.f32.xlu0 %v937_v61 }
 0x959   :  { %997 = vrot.lane.b32.xlu0 %v1499_v12, %s1422_s23 }
 0x95d   :  { %813 = vrot.lane.b32.xlu0 %v757_v31, %s1424_s25 }
 0x9cc   :  { %v936_v62 = vpop.xlane.xlu0 %935 }
 0x9cd   :  { %1307 = vrcp.f32 %v936_v62 }
 0x9d0   :  { %v939_v63 = vpop.xlane.xlu0 %938 }
 0x9d1   :  { %1309 = vrcp.f32 %v939_v63 }
 0x9d4   :  { %v998_v1 = vpop.permute.xlu0 %997 }
 0x9d5   :  { %v1003_v2 = vsel %vm258_vm3, %v998_v1, 0 }
 0x9d6   :  { %1249 = vmatpush3.bf16.msra.mxu0 %v1003_v2 }
 0x9d7   :  { %v1308_v3 = vpop.eup %1307 }
 0x9d8   :  { %v941_v4 = vmul.f32 %v1308_v3, %v1304_v46  ;;  %v814_v5 = vpop.permute.xlu0 %813 }
 0x9d9   :  { %820 = vst.msk [vmem:[#allocation2] sm:$0xff] %vm819_vm5, %v814_v5 }
 0x9da   :  { %945 = vst.msk [vmem:[#allocation9 + $0x18] sm:$0xff] %vm131_vm2, %v941_v4  ;;  %v947_v6 = vpack.c.bf16 %v941_v4, %v941_v4 }
 0x9db   :  { %v1310_v7 = vpop.eup %1309 }
 0x9dc   :  { %v943_v8 = vmul.f32 %v1310_v7, %v1306_v59  ;;  %1245 = vmatmul.mubr.msk.bf16.vlgmr.msra.gmra.mrb[28].mxu1 %vm131_vm2, %v947_v6 }
 0x9de   :  { %946 = vst.msk [vmem:[#allocation9 + $0x38] sm:$0xff] %vm131_vm2, %v943_v8  ;;  %v948_v12 = vpack.c.bf16 %v943_v8, %v943_v8 }
 0x9e0   :  { %1251 = vmatmul.mubr.msk.bf16.vlgmr.msra.gmra.mrb[32].mxu0 %vm131_vm2, %v948_v12 }
 0xaaf   :  { %v991_v10 = vpop.f32.mrb[28].mxu1 }
 0xab0   :  { %1047 = vrot.lane.b32.xlu0 %v991_v10, %s1425_s26  ;;  %v1246_v11 = vpop.f32.mrb[29].mxu1 }
 0xab1   :  { %v994_v13 = vpop.f32.mrb[30].mxu1 }
 0xab2   :  { %v1247_v20 = vpop.f32.mrb[31].mxu1 }
 0xab3   :  { %1366 = shalt.err (!%p1363_p6)
}
 0xab4   :  { %s1367_s6 = scalar_lea.hbm %s1678_s4, 1024 }
 0xab5   :  { %p1368_p7 = scmp.ne.s32.totalorder %s1678_s4, %s1367_s6  ;;  %p1371_p8 = scmp.lt.u32.totalorder %s1367_s6, %s1678_s4 }
 0xab7   :  { %p1373_p9 = pnand %p1371_p8, %p1368_p7 }
 0xab9   :  { %1376 = shalt.err (!%p1373_p9)
}
 0xaba   :  { %s1427_s11 = smov 128   ;;  %v1039_v14 = vpop.f32.mrb[32].mxu0  ;;  %vm1053_vm6 = vcmask 261312   ;;  %s1428_s13 = smov [#allocation8]  }
 0xabb   :  { %1083 = dma.vmem_to_hbm [thread:$0]  %s1078_s28, 1024, %s1678_s4, [#allocation10], %s1427_s11, %s1427_s11, %s1423_s24   ;;  %v1252_v15 = vpop.f32.mrb[33].mxu0 }
 0xabc   :  { %1049 = vrot.lane.b32.xlu1 %v1039_v14, %s1425_s26  ;;  %v1042_v16 = vpop.f32.mrb[34].mxu0  ;;  %s1065_s1 = sshll.u32 %s1428_s13, 4  ;;  %s1066_s1 = int_to_ptr.vmem [resolvable:$true] %s1065_s1 }
 0xabd   :  { %v1253_v17 = vpop.f32.mrb[35].mxu0  ;;  %s1377_s4 = scalar_lea.vmem %s1066_s1, 256  ;;  %p1382_p11 = scmp.lt.s32.totalorder %s1066_s1, %s1066_s1 }
 0xabe   :  { %p1378_p10 = scmp.ne.s32.totalorder %s1066_s1, %s1377_s4  ;;  %p1383_p12 = scmp.lt.s32.totalorder %s1377_s4, %s1377_s4 }
 0xac0   :  { %p1384_p13 = por %p1383_p12, %p1382_p11 }
 0xac2   :  { %p1385_p0 = pnand %p1384_p13, %p1378_p10 }
 0xb22   :  { %v1048_v19 = vpop.permute.xlu0 %1047 }
 0xb23   :  { %1054 = vst.msk [vmem:[#allocation2] sm:$0xff] %vm1053_vm6, %v1048_v19 }
 0xb2a   :  { %v1056_v22 = vld [vmem:[#allocation2] sm:$0xff] }
 0xb2b   :  { %1058 = vst.msk [vmem:[#allocation8] sm:$0xff] %vm77_vm1, %v1056_v22 }
 0xb2e   :  { %v1050_v21 = vpop.permute.xlu1 %1049 }
 0xb2f   :  { %1055 = vst.msk [vmem:[#allocation2 + $0x8] sm:$0xff] %vm1053_vm6, %v1050_v21 }
 0xb36   :  { %v1057_v23 = vld [vmem:[#allocation2 + $0x8] sm:$0xff] }
 0xb37   :  { %1059 = vst.msk [vmem:[#allocation8 + $0x8] sm:$0xff] %vm77_vm1, %v1057_v23 }
 0xb38   :  { %1388 = shalt.err (!%p1385_p0)
}
 0xb39   :  { %s1389_s2 = scalar_lea.hbm %s1677_s3, 256 }
 0xb3a   :  { %p1390_p1 = scmp.ne.s32.totalorder %s1677_s3, %s1389_s2  ;;  %p1393_p2 = scmp.lt.u32.totalorder %s1389_s2, %s1677_s3 }
 0xb3c   :  { %p1395_p3 = pnand %p1393_p2, %p1390_p1 }
 0xb3e   :  { %1398 = shalt.err (!%p1395_p3)
}
 0xb3f   :  { %1071 = dma.vmem_to_hbm [thread:$0]  %s1066_s1, 256, %s1677_s3, [#allocation5], %s1427_s11, %s1427_s11, %s1423_s24  }
 0xb40   :  { %1403 = dma.done.wait [#allocation5], 256  }
 0xb41   :  { %1404 = vsyncadd [#allocation5], 4294967040 }
 0xb42   :  { %1405 = dma.done.wait [#allocation10], 1024  }
 0xb43   :  { %1406 = vsyncadd [#allocation10], 4294966272 }
 0xb44   :  { %1090 = vsyncpa [#allocation4], 1 }
 0xb45   :  { %1091 = vsyncpa [#allocation7], 1 }
 0xb46   :  { %1092 = vsyncpa [#allocation5], 1 }
 0xb47   :  { %1093 = vsyncpa [#allocation10], 1 }

</bundles_post_ra>
